<compile_context>
chip_gen: v7x
topology: tpu7x:2x2x1
jax: 0.10.0
libtpu: 0.0.40
codegen_flags: <defaults>
</compile_context>

<pallas_src>
import jax
import jax.numpy as jnp
from jax.experimental import pallas as pl
from jax.experimental.pallas import tpu as pltpu


def _round_up(x, m):
    return ((x + m - 1) // m) * m


def mlp_kernel(x_ref, w1_ref, b1_ref, w2_ref, b2_ref, o_ref):
    # Hidden layer: x @ W1 + b1, ReLU.  Shapes are tiny in K/N; the kernel is
    # HBM-stream / grid-overhead bound, not MXU bound.
    h = jnp.dot(x_ref[...], w1_ref[...], preferred_element_type=jnp.float32)
    h = jnp.maximum(h + b1_ref[...], 0.0)          # b1 (1, hidden) broadcasts over tb rows
    # Output layer straight into the compact (tb, out_dim) block.
    out = jnp.dot(h, w2_ref[...], preferred_element_type=jnp.float32)
    o_ref[...] = (out + b2_ref[...]).astype(o_ref.dtype)


def trading_mlp_forward(x, w1, b1, w2, b2, *, block_b=4096, small_batch_fallback=0):
    """Forward pass of TradingMLP.

    x:  (B, input_dim)
    w1: (input_dim, hidden)   b1: (1, hidden)
    w2: (hidden, output_dim)  b2: (1, output_dim)
    Returns (B, output_dim) logits.

    small_batch_fallback: if B is below this, skip Pallas and let XLA fuse the
    tiny MLP directly (removes the pallas_call fixed cost for latency-critical
    single/small-batch inference).  Default 0 = always use the Pallas kernel.
    """
    B, in_dim = x.shape
    hidden = w1.shape[1]
    out_dim = w2.shape[1]

    if B < small_batch_fallback:
        return jnp.maximum(x @ w1 + b1, 0.0) @ w2 + b2

    # Batch tile: multiple of 8 (f32 sublane), large to amortize the ~0.35 us
    # per-grid-step overhead, but no bigger than the batch itself.
    tb = min(block_b, _round_up(B, 8))
    # v7x megacore: once the batch is big enough that splitting is cheap, make
    # sure the "parallel" batch axis has >= 2 tiles to shard across the 2 TCs.
    if B >= 2048:
        tb = min(tb, _round_up(-(-B // 2), 8))

    grid = (pl.cdiv(B, tb),)   # ragged last tile: OOB reads masked off on write

    out = pl.pallas_call(
        mlp_kernel,
        out_shape=jax.ShapeDtypeStruct((B, out_dim), x.dtype),
        grid=grid,
        in_specs=[
            # Batch-tiled activations (last dim == full array dim -> legal block).
            pl.BlockSpec((tb, in_dim), lambda i: (i, 0)),
            # Weights / biases: constant index_map -> VMEM-resident across the grid.
            pl.BlockSpec((in_dim, hidden), lambda i: (0, 0)),
            pl.BlockSpec((1, hidden), lambda i: (0, 0)),
            pl.BlockSpec((hidden, out_dim), lambda i: (0, 0)),
            pl.BlockSpec((1, out_dim), lambda i: (0, 0)),
        ],
        # Compact output block: (tb, out_dim) with out_dim == full last dim.
        out_specs=pl.BlockSpec((tb, out_dim), lambda i: (i, 0)),
        compiler_params=pltpu.CompilerParams(
            dimension_semantics=("parallel",),   # shard batch tiles across v7x's 2 TCs
        ),
    )(x, w1, b1, w2, b2)

    return out


def init_params(key, input_dim, hidden_dim=16, output_dim=3, dtype=jnp.float32):
    """Deterministic init mimicking nn.Linear default (uniform +-1/sqrt(fan_in))."""
    k1, k2, k3, k4 = jax.random.split(key, 4)
    lim1 = 1.0 / jnp.sqrt(jnp.asarray(input_dim, dtype))
    lim2 = 1.0 / jnp.sqrt(jnp.asarray(hidden_dim, dtype))
    w1 = jax.random.uniform(k1, (input_dim, hidden_dim), dtype, -lim1, lim1)
    b1 = jax.random.uniform(k2, (1, hidden_dim), dtype, -lim1, lim1)
    w2 = jax.random.uniform(k3, (hidden_dim, output_dim), dtype, -lim2, lim2)
    b2 = jax.random.uniform(k4, (1, output_dim), dtype, -lim2, lim2)
    return w1, b1, w2, b2


def _reference(x, w1, b1, w2, b2):
    return jnp.maximum(x @ w1 + b1, 0.0) @ w2 + b2


if __name__ == "__main__":
    key = jax.random.PRNGKey(0)
    kx1, kx2, kp = jax.random.split(key, 3)

    input_dim = 8        # 8 trading features per sample
    hidden_dim = 16
    output_dim = 3       # buy / hold / sell logits

    w1, b1, w2, b2 = init_params(kp, input_dim, hidden_dim, output_dim)

    # Case 1: tiny batch (single tile, exercises the small-B clamp path).
    x_small = jax.random.normal(kx1, (8, input_dim), dtype=jnp.float32)
    out_small = jax.block_until_ready(trading_mlp_forward(x_small, w1, b1, w2, b2))
    ref_small = _reference(x_small, w1, b1, w2, b2)
    assert out_small.shape == (8, output_dim)
    assert jnp.allclose(out_small, ref_small, atol=1e-5, rtol=1e-5)

    # Case 2: batch not divisible by the tile -> exercises the ragged-last-tile
    # (masked write) path and a multi-step grid.
    x_big = jax.random.normal(kx2, (300, input_dim), dtype=jnp.float32)
    out_big = jax.block_until_ready(
        trading_mlp_forward(x_big, w1, b1, w2, b2, block_b=128)
    )
    ref_big = _reference(x_big, w1, b1, w2, b2)
    assert out_big.shape == (300, output_dim)
    assert jnp.allclose(out_big, ref_big, atol=1e-5, rtol=1e-5)

    print("KERNEL_OK")
</pallas_src>

<mosaic_0001>
module attributes {stable_mosaic.version = 11 : i64} {
  func.func @mlp_kernel(%arg0: i32, %arg1: memref<8x8xf32, #tpu.memory_space<vmem>>, %arg2: memref<8x16xf32, #tpu.memory_space<vmem>>, %arg3: memref<1x16xf32, #tpu.memory_space<vmem>>, %arg4: memref<16x3xf32, #tpu.memory_space<vmem>>, %arg5: memref<1x3xf32, #tpu.memory_space<vmem>>, %arg6: memref<8x3xf32, #tpu.memory_space<vmem>>) attributes {dimension_semantics = [#tpu.dimension_semantics<parallel>], iteration_bounds = array<i64: 1>, scalar_prefetch = 0 : i64, scratch_operands = 0 : i64, tpu.core_type = #tpu.core_type<tc>, window_params = [{transform_indices = @transform_0, window_bounds = array<i64: 8, 8>}, {pipeline_mode = #tpu.pipeline_mode<synchronous>, transform_indices = @transform_1, window_bounds = array<i64: 8, 16>}, {pipeline_mode = #tpu.pipeline_mode<synchronous>, transform_indices = @transform_2, window_bounds = array<i64: 1, 16>}, {pipeline_mode = #tpu.pipeline_mode<synchronous>, transform_indices = @transform_3, window_bounds = array<i64: 16, 3>}, {pipeline_mode = #tpu.pipeline_mode<synchronous>, transform_indices = @transform_4, window_bounds = array<i64: 1, 3>}, {transform_indices = @transform_5, window_bounds = array<i64: 8, 3>}]} {
    %c0 = arith.constant 0 : index
    %c0_0 = arith.constant 0 : index
    %0 = vector.load %arg1[%c0, %c0_0] : memref<8x8xf32, #tpu.memory_space<vmem>>, vector<8x8xf32>
    %c0_1 = arith.constant 0 : index
    %c0_2 = arith.constant 0 : index
    %1 = vector.load %arg2[%c0_1, %c0_2] : memref<8x16xf32, #tpu.memory_space<vmem>>, vector<8x16xf32>
    %cst = arith.constant dense<0.000000e+00> : vector<8x16xf32>
    %2 = tpu.matmul %0, %1, %cst {dimension_numbers = #tpu.dot_dimension_numbers<[1], [0], [0], [1], [0, 0, 1, 1], [], []>} : vector<8x8xf32>, vector<8x16xf32>, vector<8x16xf32> -> vector<8x16xf32>
    %c0_3 = arith.constant 0 : index
    %c0_4 = arith.constant 0 : index
    %3 = vector.load %arg3[%c0_3, %c0_4] : memref<1x16xf32, #tpu.memory_space<vmem>>, vector<1x16xf32>
    %4 = vector.broadcast %3 : vector<1x16xf32> to vector<8x16xf32>
    %5 = arith.addf %2, %4 : vector<8x16xf32>
    %cst_5 = arith.constant 0.000000e+00 : f32
    %6 = vector.broadcast %cst_5 : f32 to vector<8x16xf32>
    %7 = arith.maximumf %5, %6 : vector<8x16xf32>
    %c0_6 = arith.constant 0 : index
    %c0_7 = arith.constant 0 : index
    %8 = vector.load %arg4[%c0_6, %c0_7] : memref<16x3xf32, #tpu.memory_space<vmem>>, vector<16x3xf32>
    %cst_8 = arith.constant dense<0.000000e+00> : vector<8x3xf32>
    %9 = tpu.matmul %7, %8, %cst_8 {dimension_numbers = #tpu.dot_dimension_numbers<[1], [0], [0], [1], [0, 0, 1, 1], [], []>} : vector<8x16xf32>, vector<16x3xf32>, vector<8x3xf32> -> vector<8x3xf32>
    %c0_9 = arith.constant 0 : index
    %c0_10 = arith.constant 0 : index
    %10 = vector.load %arg5[%c0_9, %c0_10] : memref<1x3xf32, #tpu.memory_space<vmem>>, vector<1x3xf32>
    %11 = vector.broadcast %10 : vector<1x3xf32> to vector<8x3xf32>
    %12 = arith.addf %9, %11 : vector<8x3xf32>
    %c0_11 = arith.constant 0 : index
    %c0_12 = arith.constant 0 : index
    %13 = vector.load %arg6[%c0_11, %c0_12] : memref<8x3xf32, #tpu.memory_space<vmem>>, vector<8x3xf32>
    tpu.vector_store %arg6[%c0_11, %c0_12], %12 {strides = array<i32>} : memref<8x3xf32, #tpu.memory_space<vmem>>, vector<8x3xf32>,
    return
  }
  func.func @transform_0(%arg0: i32) -> (i32, i32) {
    %c0_i32 = arith.constant 0 : i32
    %c0_i32_0 = arith.constant 0 : i32
    return %arg0, %c0_i32 : i32, i32
  }
  func.func @transform_1(%arg0: i32) -> (i32, i32) {
    %c0_i32 = arith.constant 0 : i32
    %c0_i32_0 = arith.constant 0 : i32
    %c0_i32_1 = arith.constant 0 : i32
    return %c0_i32, %c0_i32_0 : i32, i32
  }
  func.func @transform_2(%arg0: i32) -> (i32, i32) {
    %c0_i32 = arith.constant 0 : i32
    %c0_i32_0 = arith.constant 0 : i32
    %c0_i32_1 = arith.constant 0 : i32
    return %c0_i32, %c0_i32_0 : i32, i32
  }
  func.func @transform_3(%arg0: i32) -> (i32, i32) {
    %c0_i32 = arith.constant 0 : i32
    %c0_i32_0 = arith.constant 0 : i32
    %c0_i32_1 = arith.constant 0 : i32
    return %c0_i32, %c0_i32_0 : i32, i32
  }
  func.func @transform_4(%arg0: i32) -> (i32, i32) {
    %c0_i32 = arith.constant 0 : i32
    %c0_i32_0 = arith.constant 0 : i32
    %c0_i32_1 = arith.constant 0 : i32
    return %c0_i32, %c0_i32_0 : i32, i32
  }
  func.func @transform_5(%arg0: i32) -> (i32, i32) {
    %c0_i32 = arith.constant 0 : i32
    %c0_i32_0 = arith.constant 0 : i32
    return %arg0, %c0_i32 : i32, i32
  }
}

</mosaic_0001>

<bundles_post_ra>
// kernel: tpu_custom_call.1
= control target key start
LH: loop header
LB: loop body
LE: loop exit
PB: predicated region body
PF: predicated region fallthrough
CT: control target
= control target key end

     0   :  { %vm29_vm0 = vcmask 64512   ;;  %v220_v0 = vmov 0.0   ;;  %vm221_vm1 = vmmov 0   ;;  %v222_v6 = vmov 0.0|0.0   ;;  %s274_s1 = inlined_call_operand.vmem [shape: f32[8,16], index: 1, kind: input, shape index: {}]   ;;  %s275_s0 = inlined_call_operand.vmem [shape: f32[8,8], index: 0, kind: input, shape index: {}]   ;;  %s276_s3 = inlined_call_operand.vmem [shape: f32[16,3], index: 3, kind: input, shape index: {}]   ;;  %s277_s2 = inlined_call_operand.vmem [shape: f32[1,16], index: 2, kind: input, shape index: {}]   ;;  %s278_s4 = inlined_call_operand.vmem [shape: f32[1,3], index: 4, kind: input, shape index: {}]   ;;  %s279_s5 = inlined_call_operand.vmem [shape: f32[8,3], index: 5, kind: output, shape index: {}]  }
   0x1   :  { %202 = vmatprep.subr.mxu0 %v220_v0  ;;  %v21_v1 = vld [vmem:[%s274_s1] sm:$0xff]  ;;  %204 = vmatprep.mubr.msk.f32.mxu0 %vm221_vm1, %v220_v0  ;;  %v105_v4 = vld [vmem:[%s276_s3 + $0x8] sm:$0xff]  ;;  %vm113_vm2 = vcmask 130048   ;;  %vm187_vm3 = vcmask 23552  }
   0x2   :  { %v20_v2 = vld [vmem:[%s275_s0] sm:$0xff]  ;;  %203 = vmatpush3.msra.mxu0 %v21_v1  ;;  %211 = vmatprep.mubr.msk.f32.mxu1 %vm221_vm1, %v220_v0 }
   0x3   :  { %205 = vmatmul.mubr.msk.f32.vlgmr.msra.gmra.mrb[0].mxu0 %vm29_vm0, %v20_v2  ;;  %v104_v3 = vld [vmem:[%s276_s3] sm:$0xff]  ;;  %214 = vmatprep.subr.bf16.mxu1 %v222_v6 }
   0x4   :  { %v215_v5 = vpack.c.bf16 %v105_v4, %v104_v3  ;;  %v193_v7 = vld [vmem:[%s277_s2] ss:$0 sm:$0xff] }
   0x5   :  { %v195_v12 = vld [vmem:[%s278_s4] ss:$0 sm:$0xff] }
   0x6   :  { %216 = vmatpush3.bf16.msra.mxu1 %v215_v5 }
  0xd6   :  { %v99_v8 = vpop.f32.mrb[0].mxu0 }
  0xd7   :  { %v100_v9 = vadd.f32 %v193_v7, %v99_v8  ;;  %v206_v10 = vpop.f32.mrb[1].mxu0 }
  0xd9   :  { %v103_v11 = vmax.f32 %v100_v9, 0.0 }
  0xdb   :  { %212 = vmatmul.mubr.msk.f32.vlgmr.msra.gmra.mrb[0].mxu1 %vm113_vm2, %v103_v11 }
 0x1ae   :  { %v183_v13 = vpop.f32.mrb[0].mxu1 }
 0x1af   :  { %v184_v14 = vadd.f32 %v195_v12, %v183_v13  ;;  %v213_v15 = vpop.f32.mrb[1].mxu1 }
 0x1b1   :  { %188 = vst.msk [vmem:[%s279_s5] sm:$0xff] %vm187_vm3, %v184_v14 }

</bundles_post_ra>
